<compile_context>
chip_gen: v7x
topology: tpu7x:2x2x1
jax: 0.10.0
libtpu: 0.0.40
codegen_flags: <defaults>
</compile_context>

<pallas_src>
import functools

import jax
import jax.numpy as jnp
from jax.experimental import pallas as pl
from jax.experimental.pallas import tpu as pltpu


def _actor_kernel(xt_ref, w1_ref, b1_ref, w2_ref, b2_ref, w3_ref, b3_ref, o_ref):
    """Fused fc1+relu -> fc2+relu -> fc3+log_softmax, batch on the lane axis.

    xt_ref : (in_size, tile_b)  x^T           (f32 or bf16)
    wN_ref : (out, in)          torch layout  (f32 or bf16)
    bN_ref : (out, 1)           f32
    o_ref  : (action, tile_b)   f32 log-probs
    """
    x = xt_ref[...]

    # fc1 + ReLU : (hidden, in) @ (in, tile) -> (hidden, tile), f32 accumulate.
    h1 = jnp.dot(w1_ref[...], x, preferred_element_type=jnp.float32) + b1_ref[...]
    h1 = jnp.maximum(h1, 0.0)

    # fc2 + ReLU (cast activation to the weight dtype so bf16 MXU path is used).
    h2 = jnp.dot(w2_ref[...], h1.astype(w2_ref.dtype),
                 preferred_element_type=jnp.float32) + b2_ref[...]
    h2 = jnp.maximum(h2, 0.0)

    # fc3
    logits = jnp.dot(w3_ref[...], h2.astype(w3_ref.dtype),
                     preferred_element_type=jnp.float32) + b3_ref[...]

    # log_softmax over the action axis (axis 0 here == torch dim=1),
    # max-shifted for numerical stability.  action=16 -> 2-sublane reduce.
    m = jnp.max(logits, axis=0, keepdims=True)
    shifted = logits - m
    lse = jnp.log(jnp.sum(jnp.exp(shifted), axis=0, keepdims=True))
    o_ref[...] = (shifted - lse).astype(o_ref.dtype)


def _round_up(x, m):
    return ((x + m - 1) // m) * m


def _cdiv(a, b):
    return (a + b - 1) // b


_SINGLE_BLOCK_MAX_B = 512  # below this a single grid-less call beats 2 tiny tiles


@functools.partial(jax.jit, static_argnames=("block_b", "use_bf16"))
def actor_forward(x, params, block_b=1024, use_bf16=True):
    """x: (B, input_size); params: torch-layout weights. Returns (B, action) f32."""
    w1, b1 = params["w1"], params["b1"]
    w2, b2 = params["w2"], params["b2"]
    w3, b3 = params["w3"], params["b3"]

    B, in_size = x.shape
    hidden = w1.shape[0]
    action = w3.shape[0]

    op_dtype = jnp.bfloat16 if use_bf16 else x.dtype
    xt = x.astype(op_dtype).T                      # (in_size, B): batch -> lanes
    w1 = w1.astype(op_dtype)
    w2 = w2.astype(op_dtype)
    w3 = w3.astype(op_dtype)

    if B <= _SINGLE_BLOCK_MAX_B:
        # Small batch: everything (weights ~28 KB, x a few KB) trivially fits
        # VMEM on all generations; skip the pipelined grid and its overhead.
        in_specs = [pl.BlockSpec(memory_space=pltpu.MemorySpace.VMEM)
                    for _ in range(7)]
        out = pl.pallas_call(
            _actor_kernel,
            out_shape=jax.ShapeDtypeStruct((action, B), jnp.float32),
            in_specs=in_specs,
            out_specs=pl.BlockSpec(memory_space=pltpu.MemorySpace.VMEM),
        )(xt, w1, b1, w2, b2, w3, b3)
        return out.T

    # Large batch: balanced tiles, >=2 steps so the "parallel" axis can split
    # across v7x's two TensorCores.  Batch is the lane axis of every block, so
    # the tile must be a multiple of 128.
    n_steps = max(_cdiv(B, block_b), 2)
    eff_b = _round_up(_cdiv(B, n_steps), 128)
    b_pad = n_steps * eff_b
    if b_pad != B:
        xt = jnp.pad(xt, ((0, 0), (0, b_pad - B)))  # zero cols -> junk, sliced off

    const = lambda i: (0, 0)  # weights/biases: same block every step -> DMA'd once
    out = pl.pallas_call(
        _actor_kernel,
        out_shape=jax.ShapeDtypeStruct((action, b_pad), jnp.float32),
        grid_spec=pltpu.PrefetchScalarGridSpec(
            num_scalar_prefetch=0,
            grid=(n_steps,),
            in_specs=[
                pl.BlockSpec((in_size, eff_b), lambda i: (0, i)),   # x^T tile
                pl.BlockSpec((hidden, in_size), const),             # W1
                pl.BlockSpec((hidden, 1), const),                   # b1
                pl.BlockSpec((hidden, hidden), const),              # W2
                pl.BlockSpec((hidden, 1), const),                   # b2
                pl.BlockSpec((action, hidden), const),              # W3
                pl.BlockSpec((action, 1), const),                   # b3
            ],
            out_specs=pl.BlockSpec((action, eff_b), lambda i: (0, i)),
        ),
        compiler_params=pltpu.CompilerParams(
            dimension_semantics=("parallel",),   # megacore sharding on v7x
        ),
    )(xt, w1, b1, w2, b2, w3, b3)

    return out[:, :B].T


def init_actor_params(key, input_size, hidden_size, action_size):
    """nn.Linear-style U(-1/sqrt(fan_in), 1/sqrt(fan_in)) init, torch layout."""
    ks = jax.random.split(key, 6)

    def linear(kw, kb, fan_in, fan_out):
        bound = 1.0 / jnp.sqrt(jnp.float32(fan_in))
        w = jax.random.uniform(kw, (fan_out, fan_in), jnp.float32, -bound, bound)
        b = jax.random.uniform(kb, (fan_out,), jnp.float32, -bound, bound)
        return w, b.reshape(fan_out, 1)   # bias as a column: broadcasts over lanes

    w1, b1 = linear(ks[0], ks[1], input_size, hidden_size)
    w2, b2 = linear(ks[2], ks[3], hidden_size, hidden_size)
    w3, b3 = linear(ks[4], ks[5], hidden_size, action_size)
    return {"w1": w1, "b1": b1, "w2": w2, "b2": b2, "w3": w3, "b3": b3}


def actor_forward_ref(x, params, use_bf16=False):
    """Pure-JAX reference of the PyTorch forward (optionally with the same
    bf16-operand / f32-accumulate casts as the kernel)."""
    cast = (lambda a: a.astype(jnp.bfloat16)) if use_bf16 else (lambda a: a)
    h = x
    for wk, bk in (("w1", "b1"), ("w2", "b2")):
        h = jax.nn.relu(
            jnp.dot(cast(h), cast(params[wk]).T, preferred_element_type=jnp.float32)
            + params[bk][:, 0])
    logits = (jnp.dot(cast(h), cast(params["w3"]).T, preferred_element_type=jnp.float32)
              + params["b3"][:, 0])
    return jax.nn.log_softmax(logits, axis=-1)


if __name__ == "__main__":
    input_size, hidden_size, action_size = 32, 64, 16

    key = jax.random.PRNGKey(0)
    k_params, k1, k2, k3 = jax.random.split(key, 4)
    params = init_actor_params(k_params, input_size, hidden_size, action_size)

    # Case 1: tiny batch, pure f32 -> grid-less single-block path, tight check.
    x_small = jax.random.normal(k1, (8, input_size), jnp.float32)
    out_small = jax.block_until_ready(actor_forward(x_small, params, use_bf16=False))
    ref_small = actor_forward_ref(x_small, params, use_bf16=False)
    assert out_small.shape == (8, action_size)
    assert jnp.allclose(out_small, ref_small, atol=2e-5, rtol=2e-5), "mismatch (small, f32)"

    # Case 2: mid batch, bf16 MXU operands -> still the grid-less path.
    x_mid = jax.random.normal(k2, (300, input_size), jnp.float32)
    out_mid = jax.block_until_ready(actor_forward(x_mid, params, use_bf16=True))
    ref_mid = actor_forward_ref(x_mid, params, use_bf16=True)
    assert out_mid.shape == (300, action_size)
    assert jnp.allclose(out_mid, ref_mid, atol=2e-3, rtol=2e-3), "mismatch (mid, bf16)"

    # Case 3: batch > 512 -> pipelined grid path, 2 balanced 128-multiple tiles
    # (eff_b=384, padded to 768), "parallel" across TensorCores on v7x.
    x_big = jax.random.normal(k3, (600, input_size), jnp.float32)
    out_big = jax.block_until_ready(actor_forward(x_big, params, use_bf16=True))
    ref_big = actor_forward_ref(x_big, params, use_bf16=True)
    assert out_big.shape == (600, action_size)
    assert jnp.allclose(out_big, ref_big, atol=2e-3, rtol=2e-3), "mismatch (big, bf16)"

    print("KERNEL_OK")
</pallas_src>

<mosaic_0001>
module attributes {stable_mosaic.version = 11 : i64} {
  func.func @_actor_kernel(%arg0: memref<32x8xf32, #tpu.memory_space<vmem>>, %arg1: memref<64x32xf32, #tpu.memory_space<vmem>>, %arg2: memref<64x1xf32, #tpu.memory_space<vmem>>, %arg3: memref<64x64xf32, #tpu.memory_space<vmem>>, %arg4: memref<64x1xf32, #tpu.memory_space<vmem>>, %arg5: memref<16x64xf32, #tpu.memory_space<vmem>>, %arg6: memref<16x1xf32, #tpu.memory_space<vmem>>, %arg7: memref<16x8xf32, #tpu.memory_space<vmem>>) attributes {dimension_semantics = [], scalar_prefetch = 0 : i64, scratch_operands = 0 : i64, tpu.core_type = #tpu.core_type<tc>} {
    %c0 = arith.constant 0 : index
    %c0_0 = arith.constant 0 : index
    %0 = vector.load %arg0[%c0, %c0_0] : memref<32x8xf32, #tpu.memory_space<vmem>>, vector<32x8xf32>
    %c0_1 = arith.constant 0 : index
    %c0_2 = arith.constant 0 : index
    %1 = vector.load %arg1[%c0_1, %c0_2] : memref<64x32xf32, #tpu.memory_space<vmem>>, vector<64x32xf32>
    %cst = arith.constant dense<0.000000e+00> : vector<64x8xf32>
    %2 = tpu.matmul %1, %0, %cst {dimension_numbers = #tpu.dot_dimension_numbers<[1], [0], [0], [1], [0, 0, 1, 1], [], []>} : vector<64x32xf32>, vector<32x8xf32>, vector<64x8xf32> -> vector<64x8xf32>
    %c0_3 = arith.constant 0 : index
    %c0_4 = arith.constant 0 : index
    %3 = vector.load %arg2[%c0_3, %c0_4] : memref<64x1xf32, #tpu.memory_space<vmem>>, vector<64x1xf32>
    %4 = vector.broadcast %3 : vector<64x1xf32> to vector<64x8xf32>
    %5 = arith.addf %2, %4 : vector<64x8xf32>
    %cst_5 = arith.constant 0.000000e+00 : f32
    %6 = vector.broadcast %cst_5 : f32 to vector<64x8xf32>
    %7 = arith.maximumf %5, %6 : vector<64x8xf32>
    %c0_6 = arith.constant 0 : index
    %c0_7 = arith.constant 0 : index
    %8 = vector.load %arg3[%c0_6, %c0_7] : memref<64x64xf32, #tpu.memory_space<vmem>>, vector<64x64xf32>
    %cst_8 = arith.constant dense<0.000000e+00> : vector<64x8xf32>
    %9 = tpu.matmul %8, %7, %cst_8 {dimension_numbers = #tpu.dot_dimension_numbers<[1], [0], [0], [1], [0, 0, 1, 1], [], []>} : vector<64x64xf32>, vector<64x8xf32>, vector<64x8xf32> -> vector<64x8xf32>
    %c0_9 = arith.constant 0 : index
    %c0_10 = arith.constant 0 : index
    %10 = vector.load %arg4[%c0_9, %c0_10] : memref<64x1xf32, #tpu.memory_space<vmem>>, vector<64x1xf32>
    %11 = vector.broadcast %10 : vector<64x1xf32> to vector<64x8xf32>
    %12 = arith.addf %9, %11 : vector<64x8xf32>
    %cst_11 = arith.constant 0.000000e+00 : f32
    %13 = vector.broadcast %cst_11 : f32 to vector<64x8xf32>
    %14 = arith.maximumf %12, %13 : vector<64x8xf32>
    %c0_12 = arith.constant 0 : index
    %c0_13 = arith.constant 0 : index
    %15 = vector.load %arg5[%c0_12, %c0_13] : memref<16x64xf32, #tpu.memory_space<vmem>>, vector<16x64xf32>
    %cst_14 = arith.constant dense<0.000000e+00> : vector<16x8xf32>
    %16 = tpu.matmul %15, %14, %cst_14 {dimension_numbers = #tpu.dot_dimension_numbers<[1], [0], [0], [1], [0, 0, 1, 1], [], []>} : vector<16x64xf32>, vector<64x8xf32>, vector<16x8xf32> -> vector<16x8xf32>
    %c0_15 = arith.constant 0 : index
    %c0_16 = arith.constant 0 : index
    %17 = vector.load %arg6[%c0_15, %c0_16] : memref<16x1xf32, #tpu.memory_space<vmem>>, vector<16x1xf32>
    %18 = vector.broadcast %17 : vector<16x1xf32> to vector<16x8xf32>
    %19 = arith.addf %16, %18 : vector<16x8xf32>
    %cst_17 = arith.constant dense<0xFF800000> : vector<8xf32>
    %20 = vector.multi_reduction <maximumf>, %19, %cst_17 [0] : vector<16x8xf32> to vector<8xf32>
    %21 = vector.shape_cast %20 : vector<8xf32> to vector<1x8xf32>
    %22 = vector.broadcast %21 : vector<1x8xf32> to vector<16x8xf32>
    %23 = arith.subf %19, %22 : vector<16x8xf32>
    %24 = math.exp %23 : vector<16x8xf32>
    %cst_18 = arith.constant dense<0.000000e+00> : vector<8xf32>
    %25 = vector.multi_reduction <add>, %24, %cst_18 [0] : vector<16x8xf32> to vector<8xf32>
    %26 = vector.shape_cast %25 : vector<8xf32> to vector<1x8xf32>
    %27 = math.log %26 : vector<1x8xf32>
    %28 = vector.broadcast %27 : vector<1x8xf32> to vector<16x8xf32>
    %29 = arith.subf %23, %28 : vector<16x8xf32>
    %c0_19 = arith.constant 0 : index
    %c0_20 = arith.constant 0 : index
    %30 = vector.load %arg7[%c0_19, %c0_20] : memref<16x8xf32, #tpu.memory_space<vmem>>, vector<16x8xf32>
    tpu.vector_store %arg7[%c0_19, %c0_20], %29 {strides = array<i32>} : memref<16x8xf32, #tpu.memory_space<vmem>>, vector<16x8xf32>,
    return
  }
}

</mosaic_0001>

<bundles_post_ra>
// kernel: actor_forward.1
= control target key start
LH: loop header
LB: loop body
LE: loop exit
PB: predicated region body
PF: predicated region fallthrough
CT: control target
= control target key end

     0   :  { %vm86_vm0 = vcmask 261120   ;;  %v720_v3 = vmov 0   ;;  %vm280_vm1 = vcmask 523264   ;;  %vm513_vm2 = vcmask 64512   ;;  %s911_s0 = inlined_call_operand.vmem [shape: f32[32,8], index: 0, kind: input, shape index: {}]   ;;  %s912_s1 = inlined_call_operand.vmem [shape: f32[64,32], index: 1, kind: input, shape index: {}]   ;;  %s913_s2 = inlined_call_operand.vmem [shape: f32[64,1], index: 2, kind: input, shape index: {}]   ;;  %s914_s4 = inlined_call_operand.vmem [shape: f32[64,1], index: 4, kind: input, shape index: {}]   ;;  %s915_s6 = inlined_call_operand.vmem [shape: f32[16,1], index: 6, kind: input, shape index: {}]   ;;  %s916_s3 = inlined_call_operand.vmem [shape: f32[64,64], index: 3, kind: input, shape index: {}]   ;;  %s917_s5 = inlined_call_operand.vmem [shape: f32[16,64], index: 5, kind: input, shape index: {}]   ;;  %s918_s7 = inlined_call_operand.vmem [shape: f32[16,8], index: 7, kind: output, shape index: {}]  }
   0x1   :  { %v26_v0 = vld [vmem:[%s911_s0] sm:$0xff]  ;;  %v27_v1 = vld [vmem:[%s911_s0 + $0x8] sm:$0xff]  ;;  %v28_v2 = vld [vmem:[%s911_s0 + $0x10] sm:$0xff]  ;;  %712 = vset.pattern.permute.xlu0 %v720_v3  ;;  %713 = vset.pattern.permute.xlu1 %v720_v3 }
   0x2   :  { %v671_v4 = vpack.c.bf16 %v27_v1, %v26_v0  ;;  %v29_v5 = vld [vmem:[%s911_s0 + $0x18] sm:$0xff]  ;;  %v30_v6 = vld [vmem:[%s912_s1] sm:$0xff]  ;;  %v40_v9 = vld [vmem:[%s913_s2 + $0x10] sm:$0xff] }
   0x3   :  { %v675_v7 = vpack.c.bf16 %v29_v5, %v28_v2  ;;  %612 = vmatprep.mubr.msk.f32.mxu0 %vm86_vm0, %v30_v6  ;;  %v38_v8 = vld [vmem:[%s913_s2] sm:$0xff]  ;;  %58 = vperm.xlu1 %713, %v40_v9   ;;  %v39_v10 = vld [vmem:[%s913_s2 + $0x8] sm:$0xff]  ;;  %v41_v11 = vld [vmem:[%s913_s2 + $0x18] sm:$0xff] }
   0x4   :  { %672 = vmatprep.subr.bf16.mxu0 %v671_v4  ;;  %48 = vperm.xlu0 %712, %v38_v8   ;;  %v31_v12 = vld [vmem:[%s912_s1 + $0x8] sm:$0xff]  ;;  %v32_v13 = vld [vmem:[%s912_s1 + $0x10] sm:$0xff]  ;;  %v42_v14 = vld [vmem:[%s913_s2 + $0x20] sm:$0xff] }
   0x5   :  { %674 = vmatpush3.bf16.msra.mxu0 %v671_v4  ;;  %v43_v15 = vld [vmem:[%s913_s2 + $0x28] sm:$0xff]  ;;  %v33_v16 = vld [vmem:[%s912_s1 + $0x18] sm:$0xff]  ;;  %v34_v17 = vld [vmem:[%s912_s1 + $0x20] sm:$0xff] }
   0x6   :  { %676 = vmatprep.subr.bf16.mxu0 %v675_v7  ;;  %v44_v18 = vld [vmem:[%s913_s2 + $0x30] sm:$0xff]  ;;  %v45_v19 = vld [vmem:[%s913_s2 + $0x38] sm:$0xff]  ;;  %v35_v20 = vld [vmem:[%s912_s1 + $0x28] sm:$0xff] }
   0x7   :  { %63 = vperm.xlu1 %713, %v41_v11   ;;  %v36_v21 = vld [vmem:[%s912_s1 + $0x30] sm:$0xff]  ;;  %v232_v22 = vld [vmem:[%s914_s4] sm:$0xff]  ;;  %v233_v23 = vld [vmem:[%s914_s4 + $0x8] sm:$0xff] }
   0x8   :  { %53 = vperm.xlu0 %712, %v39_v10   ;;  %v37_v24 = vld [vmem:[%s912_s1 + $0x38] sm:$0xff]  ;;  %v234_v25 = vld [vmem:[%s914_s4 + $0x10] sm:$0xff]  ;;  %v236_v27 = vld [vmem:[%s914_s4 + $0x20] sm:$0xff] }
   0x9   :  { %678 = vmatpush3.bf16.msra.mxu0 %v675_v7  ;;  %v235_v26 = vld [vmem:[%s914_s4 + $0x18] sm:$0xff]  ;;  %v237_v28 = vld [vmem:[%s914_s4 + $0x28] sm:$0xff]  ;;  %v238_v29 = vld [vmem:[%s914_s4 + $0x30] sm:$0xff] }
   0xa   :  { %v239_v30 = vld [vmem:[%s914_s4 + $0x38] sm:$0xff]  ;;  %v420_v31 = vld [vmem:[%s915_s6] sm:$0xff]  ;;  %v421_v32 = vld [vmem:[%s915_s6 + $0x8] sm:$0xff] }
   0xb   :  { %73 = vperm.xlu1 %713, %v43_v15   ;;  %v224_v33 = vld [vmem:[%s916_s3] sm:$0xff]  ;;  %v225_v6 = vld [vmem:[%s916_s3 + $0x8] sm:$0xff]  ;;  %v226_v7 = vld [vmem:[%s916_s3 + $0x10] sm:$0xff] }
   0xc   :  { %613 = vmatmul.mubr.msk.f32.vlgmr.msra.gmra.mrb[0].mxu0 %vm86_vm0, %v31_v12  ;;  %68 = vperm.xlu0 %712, %v42_v14   ;;  %v227_v8 = vld [vmem:[%s916_s3 + $0x18] sm:$0xff]  ;;  %v228_v9 = vld [vmem:[%s916_s3 + $0x20] sm:$0xff]  ;;  %v229_v10 = vld [vmem:[%s916_s3 + $0x28] sm:$0xff] }
   0xd   :  { %615 = vmatprep.mubr.msk.f32.mxu0 %vm86_vm0, %v32_v13  ;;  %640 = vmatprep.mubr.msk.f32.mxu1 %vm280_vm1, %v224_v33  ;;  %v230_v11 = vld [vmem:[%s916_s3 + $0x30] sm:$0xff]  ;;  %v231_v12 = vld [vmem:[%s916_s3 + $0x38] sm:$0xff]  ;;  %v418_v13 = vld [vmem:[%s917_s5] sm:$0xff] }
   0xf   :  { %83 = vperm.xlu1 %713, %v45_v19  }
  0x10   :  { %616 = vmatmul.mubr.msk.f32.gmra.mrb[2].mxu0 %vm86_vm0, %v33_v16  ;;  %78 = vperm.xlu0 %712, %v44_v18  }
  0x11   :  { %618 = vmatprep.mubr.msk.f32.mxu0 %vm86_vm0, %v34_v17 }
  0x13   :  { %247 = vperm.xlu1 %713, %v233_v23  }
  0x14   :  { %619 = vmatmul.mubr.msk.f32.gmra.mrb[4].mxu0 %vm86_vm0, %v35_v20  ;;  %242 = vperm.xlu0 %712, %v232_v22  }
  0x15   :  { %621 = vmatprep.mubr.msk.f32.mxu0 %vm86_vm0, %v36_v21 }
  0x17   :  { %257 = vperm.xlu1 %713, %v235_v26  }
  0x18   :  { %622 = vmatmul.mubr.msk.f32.gmra.mrb[6].mxu0 %vm86_vm0, %v37_v24  ;;  %252 = vperm.xlu0 %712, %v234_v25  }
  0x19   :  { %668 = vmatprep.mubr.msk.f32.mxu0 %vm280_vm1, %v418_v13 }
  0x1b   :  { %267 = vperm.xlu1 %713, %v237_v28  }
  0x1c   :  { %262 = vperm.xlu0 %712, %v236_v27  }
  0x1f   :  { %277 = vperm.xlu1 %713, %v239_v30  }
  0x20   :  { %272 = vperm.xlu0 %712, %v238_v29  }
  0x23   :  { %429 = vperm.xlu1 %713, %v421_v32  }
  0x24   :  { %424 = vperm.xlu0 %712, %v420_v31  }
  0x82   :  { %v59_v35 = vpop.permute.xlu1 %58 }
  0x83   :  { %v49_v34 = vpop.permute.xlu0 %48 }
  0x86   :  { %v64_v37 = vpop.permute.xlu1 %63 }
  0x87   :  { %v54_v36 = vpop.permute.xlu0 %53 }
  0x8a   :  { %v74_v47 = vpop.permute.xlu1 %73 }
  0x8b   :  { %v69_v50 = vpop.permute.xlu0 %68 }
  0x8e   :  { %v84_v59 = vpop.permute.xlu1 %83 }
  0x8f   :  { %v79_v62 = vpop.permute.xlu0 %78 }
  0x92   :  { %v248_v14 = vpop.permute.xlu1 %247 }
  0x93   :  { %v243_v15 = vpop.permute.xlu0 %242 }
  0x96   :  { %v258_v16 = vpop.permute.xlu1 %257 }
  0x97   :  { %v253_v18 = vpop.permute.xlu0 %252 }
  0x9a   :  { %v268_v27 = vpop.permute.xlu1 %267 }
  0x9b   :  { %v263_v30 = vpop.permute.xlu0 %262 }
  0xdf   :  { %v614_v38 = vpop.f32.mrb[0].mxu0 }
  0xe0   :  { %v183_v39 = vadd.f32 %v614_v38, %v54_v36  ;;  %v177_v40 = vpop.f32.mrb[1].mxu0 }
  0xe1   :  { %v178_v41 = vadd.f32 %v177_v40, %v49_v34 }
  0xe2   :  { %v217_v42 = vmax.f32 %v183_v39, 0.0  ;;  %v278_v39 = vpop.permute.xlu1 %277 }
  0xe3   :  { %v216_v43 = vmax.f32 %v178_v41, 0.0  ;;  %v617_v44 = vpop.f32.mrb[2].mxu0 }
  0xe4   :  { %v193_v45 = vadd.f32 %v617_v44, %v64_v37  ;;  %v187_v46 = vpop.f32.mrb[3].mxu0 }
  0xe5   :  { %v188_v48 = vadd.f32 %v187_v46, %v59_v35  ;;  %v679_v49 = vpack.c.bf16 %v217_v42, %v216_v43  ;;  %v273_v42 = vpop.permute.xlu0 %272 }
  0xe6   :  { %v219_v51 = vmax.f32 %v193_v45, 0.0 }
  0xe7   :  { %v218_v52 = vmax.f32 %v188_v48, 0.0  ;;  %v620_v53 = vpop.f32.mrb[4].mxu0  ;;  %680 = vmatprep.subr.bf16.mxu1 %v679_v49 }
  0xe8   :  { %v203_v54 = vadd.f32 %v620_v53, %v74_v47  ;;  %v197_v55 = vpop.f32.mrb[5].mxu0  ;;  %682 = vmatpush3.bf16.msra.mxu1 %v679_v49 }
  0xe9   :  { %v683_v56 = vpack.c.bf16 %v219_v51, %v218_v52  ;;  %v198_v57 = vadd.f32 %v197_v55, %v69_v50  ;;  %v419_v50 = vld [vmem:[%s917_s5 + $0x8] sm:$0xff]  ;;  %v430_v51 = vpop.permute.xlu1 %429  ;;  %v425_v53 = vpop.permute.xlu0 %424 }
  0xea   :  { %v221_v58 = vmax.f32 %v203_v54, 0.0 }
  0xeb   :  { %v220_v60 = vmax.f32 %v198_v57, 0.0  ;;  %v623_v61 = vpop.f32.mrb[6].mxu0  ;;  %684 = vmatprep.subr.bf16.mxu1 %v683_v56 }
  0xec   :  { %v213_v63 = vadd.f32 %v623_v61, %v84_v59  ;;  %v207_v0 = vpop.f32.mrb[7].mxu0  ;;  %686 = vmatpush3.bf16.msra.mxu1 %v683_v56 }
  0xed   :  { %v687_v1 = vpack.c.bf16 %v221_v58, %v220_v60  ;;  %v208_v2 = vadd.f32 %v207_v0, %v79_v62 }
  0xee   :  { %v223_v3 = vmax.f32 %v213_v63, 0.0 }
  0xef   :  { %v222_v4 = vmax.f32 %v208_v2, 0.0  ;;  %688 = vmatprep.subr.bf16.mxu1 %v687_v1 }
  0xf0   :  { %690 = vmatpush3.bf16.msra.mxu1 %v687_v1 }
  0xf1   :  { %v691_v5 = vpack.c.bf16 %v223_v3, %v222_v4 }
  0xf3   :  { %692 = vmatprep.subr.bf16.mxu1 %v691_v5 }
  0xf4   :  { %694 = vmatpush3.bf16.msra.mxu1 %v691_v5 }
  0xf7   :  { %641 = vmatmul.mubr.msk.f32.vlgmr.msra.gmra.mrb[0].mxu1 %vm280_vm1, %v225_v6 }
  0xf8   :  { %643 = vmatprep.mubr.msk.f32.mxu1 %vm280_vm1, %v226_v7 }
  0xfb   :  { %644 = vmatmul.mubr.msk.f32.gmra.mrb[2].mxu1 %vm280_vm1, %v227_v8 }
  0xfc   :  { %646 = vmatprep.mubr.msk.f32.mxu1 %vm280_vm1, %v228_v9 }
  0xff   :  { %647 = vmatmul.mubr.msk.f32.gmra.mrb[4].mxu1 %vm280_vm1, %v229_v10 }
 0x100   :  { %649 = vmatprep.mubr.msk.f32.mxu1 %vm280_vm1, %v230_v11 }
 0x103   :  { %650 = vmatmul.mubr.msk.f32.gmra.mrb[6].mxu1 %vm280_vm1, %v231_v12 }
 0x1ca   :  { %v642_v17 = vpop.f32.mrb[0].mxu1 }
 0x1cb   :  { %v377_v19 = vadd.f32 %v642_v17, %v248_v14  ;;  %v371_v20 = vpop.f32.mrb[1].mxu1 }
 0x1cc   :  { %v372_v21 = vadd.f32 %v371_v20, %v243_v15 }
 0x1cd   :  { %v411_v22 = vmax.f32 %v377_v19, 0.0 }
 0x1ce   :  { %v410_v23 = vmax.f32 %v372_v21, 0.0  ;;  %v645_v24 = vpop.f32.mrb[2].mxu1 }
 0x1cf   :  { %v387_v25 = vadd.f32 %v645_v24, %v258_v16  ;;  %v381_v26 = vpop.f32.mrb[3].mxu1 }
 0x1d0   :  { %v695_v28 = vpack.c.bf16 %v411_v22, %v410_v23  ;;  %v382_v29 = vadd.f32 %v381_v26, %v253_v18 }
 0x1d1   :  { %v413_v31 = vmax.f32 %v387_v25, 0.0 }
 0x1d2   :  { %v412_v32 = vmax.f32 %v382_v29, 0.0  ;;  %v648_v33 = vpop.f32.mrb[4].mxu1  ;;  %696 = vmatprep.subr.bf16.mxu0 %v695_v28 }
 0x1d3   :  { %v397_v34 = vadd.f32 %v648_v33, %v268_v27  ;;  %v391_v35 = vpop.f32.mrb[5].mxu1  ;;  %698 = vmatpush3.bf16.msra.mxu0 %v695_v28 }
 0x1d4   :  { %v699_v36 = vpack.c.bf16 %v413_v31, %v412_v32  ;;  %v392_v37 = vadd.f32 %v391_v35, %v263_v30 }
 0x1d5   :  { %v415_v38 = vmax.f32 %v397_v34, 0.0 }
 0x1d6   :  { %v414_v40 = vmax.f32 %v392_v37, 0.0  ;;  %v651_v41 = vpop.f32.mrb[6].mxu1  ;;  %700 = vmatprep.subr.bf16.mxu0 %v699_v36 }
 0x1d7   :  { %v407_v43 = vadd.f32 %v651_v41, %v278_v39  ;;  %v401_v44 = vpop.f32.mrb[7].mxu1  ;;  %702 = vmatpush3.bf16.msra.mxu0 %v699_v36 }
 0x1d8   :  { %v703_v45 = vpack.c.bf16 %v415_v38, %v414_v40  ;;  %v402_v46 = vadd.f32 %v401_v44, %v273_v42 }
 0x1d9   :  { %v417_v47 = vmax.f32 %v407_v43, 0.0 }
 0x1da   :  { %v416_v48 = vmax.f32 %v402_v46, 0.0  ;;  %704 = vmatprep.subr.bf16.mxu0 %v703_v45 }
 0x1db   :  { %706 = vmatpush3.bf16.msra.mxu0 %v703_v45 }
 0x1dc   :  { %v707_v49 = vpack.c.bf16 %v417_v47, %v416_v48 }
 0x1de   :  { %708 = vmatprep.subr.bf16.mxu0 %v707_v49 }
 0x1df   :  { %710 = vmatpush3.bf16.msra.mxu0 %v707_v49 }
 0x1e2   :  { %669 = vmatmul.mubr.msk.f32.vlgmr.msra.gmra.mrb[8].mxu0 %vm280_vm1, %v419_v50 }
 0x2b5   :  { %v670_v52 = vpop.f32.mrb[8].mxu0 }
 0x2b6   :  { %v510_v54 = vadd.f32 %v670_v52, %v430_v51  ;;  %v504_v55 = vpop.f32.mrb[9].mxu0 }
 0x2b7   :  { %v505_v56 = vadd.f32 %v504_v55, %v425_v53 }
 0x2b8   :  { %v515_v57 = vsel %vm513_vm2, %v510_v54, -inf }
 0x2b9   :  { %v514_v58 = vsel %vm513_vm2, %v505_v56, -inf }
 0x2ba   :  { %v516_v59 = vmax.f32 %v514_v58, %v515_v57 }
 0x2bc   :  { %v517_v60 = vrot.slane %v516_v59, 4 }
 0x2be   :  { %v518_v61 = vmax.f32 %v516_v59, %v517_v60 }
 0x2c0   :  { %v519_v62 = vrot.slane %v518_v61, 2 }
 0x2c2   :  { %v520_v63 = vmax.f32 %v518_v61, %v519_v62 }
 0x2c4   :  { %v521_v0 = vrot.slane %v520_v63, 1 }
 0x2c6   :  { %v522_v1 = vmax.f32 %v520_v63, %v521_v0 }
 0x2c8   :  { %v523_v2 = vsub.f32 %v505_v56, %v522_v1  ;;  %v524_v3 = vsub.f32 %v510_v54, %v522_v1 }
 0x2ca   :  { %v525_v4 = vmul.f32 1.442695, %v523_v2  ;;  %v527_v5 = vmul.f32 1.442695, %v524_v3 }
 0x2cc   :  { %714 = vpow2.f32 %v525_v4 }
 0x2cd   :  { %716 = vpow2.f32 %v527_v5 }
 0x2d6   :  { %v715_v6 = vpop.eup %714 }
 0x2d7   :  { %v717_v7 = vpop.eup %716  ;;  %v529_v8 = vsel %vm513_vm2, %v715_v6, 0.0 }
 0x2d8   :  { %v530_v9 = vsel %vm513_vm2, %v717_v7, 0.0 }
 0x2d9   :  { %v531_v10 = vadd.f32 %v530_v9, %v529_v8 }
 0x2db   :  { %v532_v11 = vrot.slane %v531_v10, 4 }
 0x2dd   :  { %v533_v12 = vadd.f32 %v532_v11, %v531_v10 }
 0x2df   :  { %v534_v13 = vrot.slane %v533_v12, 2 }
 0x2e1   :  { %v535_v14 = vadd.f32 %v534_v13, %v533_v12 }
 0x2e3   :  { %v536_v15 = vrot.slane %v535_v14, 1 }
 0x2e5   :  { %v537_v16 = vadd.f32 %v536_v15, %v535_v14 }
 0x2e7   :  { %718 = vlog2.f32 %v537_v16 }
 0x2f1   :  { %v719_v17 = vpop.eup %718 }
 0x2f2   :  { %v539_v18 = vmul.f32 0.6931472, %v719_v17 }
 0x2f4   :  { %v540_v19 = vsub.f32 %v523_v2, %v539_v18  ;;  %v541_v20 = vsub.f32 %v524_v3, %v539_v18 }
 0x2f6   :  { %542 = vst.msk [vmem:[%s918_s7] sm:$0xff] %vm513_vm2, %v540_v19  ;;  %543 = vst.msk [vmem:[%s918_s7 + $0x8] sm:$0xff] %vm513_vm2, %v541_v20 }

</bundles_post_ra>
